<compile_context>
chip_gen: v6e
topology: v6e:2x2x1
jax: 0.10.0
libtpu: 0.0.40
codegen_flags: <defaults>
</compile_context>

<pallas_src>
import functools

import jax
import jax.numpy as jnp
from jax.experimental import pallas as pl
from jax.experimental.pallas import tpu as pltpu

BN_EPS = 1e-5
NEG_SLOPE = 0.2
MXU_DTYPE = jnp.bfloat16          # MXU operand / inter-layer activation dtype


def _round_up(x, m):
    return (x + m - 1) // m * m


def _pick_tile(dim, cap=512):
    """Largest multiple of 128 (<= cap) dividing dim (dim is a multiple of 128)."""
    t = min(dim, cap)
    while t >= 128:
        if dim % t == 0:
            return t
        t -= 128
    return dim


# ----------------------------------------------------------------------------
# Fused tiled GEMM + bias + (batch-stat BatchNorm) + activation
# ----------------------------------------------------------------------------
def _gemm_bn_act_kernel(*refs, use_bn, act, groups):
    if use_bn:
        x_ref, w_ref, b_ref, g_ref, beta_ref, o_ref, acc_ref = refs
    else:
        x_ref, w_ref, b_ref, o_ref, acc_ref = refs
        g_ref = beta_ref = None

    k = pl.program_id(1)

    @pl.when(k == 0)
    def _():
        acc_ref[...] = jnp.zeros_like(acc_ref)

    acc_ref[...] += jnp.dot(x_ref[...], w_ref[...],
                            preferred_element_type=jnp.float32)

    @pl.when(k == pl.num_programs(1) - 1)
    def _():
        y = acc_ref[...] + b_ref[...]                       # (rows, tn) f32
        if use_bn:
            # Batch statistics over rows (= (N,H,W) for convs, batch for BN1d).
            col_mean = jnp.mean(y, axis=0, keepdims=True)
            if groups == 1:
                mean = col_mean
                var = jnp.mean((y - col_mean) ** 2, axis=0, keepdims=True)
            else:
                # Sub-pixel deconv: columns are (phase, channel); BN stats are
                # per channel across ALL phases (and all rows).  Group width is
                # a multiple of 128, so these are lane-aligned slices.
                C = y.shape[1] // groups
                col_sq = jnp.mean(y * y, axis=0, keepdims=True)
                mean_c = sum(col_mean[:, g * C:(g + 1) * C]
                             for g in range(groups)) / groups
                sq_c = sum(col_sq[:, g * C:(g + 1) * C]
                           for g in range(groups)) / groups
                var_c = jnp.maximum(sq_c - mean_c * mean_c, 0.0)
                mean = jnp.concatenate([mean_c] * groups, axis=1)
                var = jnp.concatenate([var_c] * groups, axis=1)
            y = g_ref[...] * (y - mean) * jax.lax.rsqrt(var + BN_EPS) + beta_ref[...]
        if act == "leaky":
            y = jnp.where(y >= 0, y, NEG_SLOPE * y)
        elif act == "tanh":
            y = jnp.tanh(y)
        o_ref[...] = y.astype(o_ref.dtype)


def fused_gemm(x, w, b, gamma=None, beta=None, *, use_bn, act, groups=1,
               out_dtype=jnp.float32):
    """(rows,K)@(K,N) + bias [+ batch-stat BN] [+ act], tiled over (N, K)."""
    rows, K = x.shape
    K2, N = w.shape
    assert K == K2
    Kp = _round_up(K, 128)
    Np = _round_up(N, 128)

    tk = _pick_tile(Kp)
    if use_bn and groups > 1:
        # cross-phase BN stats need every phase group of a channel in one tile
        assert Np == N, "grouped-BN output width must be a multiple of 128"
        tn = Np
    else:
        tn = _pick_tile(Np)

    x_p = jnp.pad(x.astype(MXU_DTYPE), ((0, 0), (0, Kp - K)))
    w_p = jnp.pad(w.astype(MXU_DTYPE), ((0, Kp - K), (0, Np - N)))
    b_p = jnp.pad(jnp.asarray(b, jnp.float32).reshape(1, N), ((0, 0), (0, Np - N)))

    operands = [x_p, w_p, b_p]
    in_specs = [
        pl.BlockSpec((rows, tk), lambda n, k: (0, k)),
        pl.BlockSpec((tk, tn), lambda n, k: (k, n)),
        pl.BlockSpec((1, tn), lambda n, k: (0, n)),
    ]
    if use_bn:
        g_p = jnp.pad(jnp.asarray(gamma, jnp.float32).reshape(1, N),
                      ((0, 0), (0, Np - N)))
        be_p = jnp.pad(jnp.asarray(beta, jnp.float32).reshape(1, N),
                       ((0, 0), (0, Np - N)))
        operands += [g_p, be_p]
        in_specs += [pl.BlockSpec((1, tn), lambda n, k: (0, n)),
                     pl.BlockSpec((1, tn), lambda n, k: (0, n))]

    kern = functools.partial(_gemm_bn_act_kernel,
                             use_bn=use_bn, act=act, groups=groups)
    out = pl.pallas_call(
        kern,
        out_shape=jax.ShapeDtypeStruct((rows, Np), out_dtype),
        grid=(Np // tn, Kp // tk),
        in_specs=in_specs,
        out_specs=pl.BlockSpec((rows, tn), lambda n, k: (0, n)),
        scratch_shapes=[pltpu.VMEM((rows, tn), jnp.float32)],
        compiler_params=pltpu.CompilerParams(
            dimension_semantics=("parallel", "arbitrary")),
    )(*operands)
    return out[:, :N]


# ----------------------------------------------------------------------------
# Fused fc_mu + fc_logvar + reparameterize (single tiny kernel)
# ----------------------------------------------------------------------------
def _latent_kernel(h_ref, w_ref, b_ref, eps_ref, mu_ref, lv_ref, z_ref, *, half):
    y = jnp.dot(h_ref[...], w_ref[...],
                preferred_element_type=jnp.float32) + b_ref[...]
    mu = y[:, :half]
    lv = y[:, half:]
    mu_ref[...] = mu
    lv_ref[...] = lv
    z_ref[...] = mu + eps_ref[...] * jnp.exp(0.5 * lv)


def latent_fused(h_comb, mu_w, mu_b, lv_w, lv_b, eps):
    B, K = h_comb.shape
    L = mu_w.shape[0]                       # torch Linear weight: (out, in)
    Lp = _round_up(L, 128)                  # lane-aligned mu / logvar halves
    Wc = jnp.zeros((K, 2 * Lp), jnp.float32)
    Wc = Wc.at[:, :L].set(mu_w.T).at[:, Lp:Lp + L].set(lv_w.T)
    bc = jnp.zeros((1, 2 * Lp), jnp.float32)
    bc = bc.at[0, :L].set(mu_b).at[0, Lp:Lp + L].set(lv_b)
    eps_p = jnp.pad(eps.astype(jnp.float32), ((0, 0), (0, Lp - L)))

    mu_f, lv_f, z_f = pl.pallas_call(
        functools.partial(_latent_kernel, half=Lp),
        out_shape=(jax.ShapeDtypeStruct((B, Lp), jnp.float32),
                   jax.ShapeDtypeStruct((B, Lp), jnp.float32),
                   jax.ShapeDtypeStruct((B, Lp), jnp.float32)),
        grid=(1,),
        in_specs=[pl.BlockSpec((B, K), lambda i: (0, 0)),
                  pl.BlockSpec((K, 2 * Lp), lambda i: (0, 0)),
                  pl.BlockSpec((1, 2 * Lp), lambda i: (0, 0)),
                  pl.BlockSpec((B, Lp), lambda i: (0, 0))],
        out_specs=(pl.BlockSpec((B, Lp), lambda i: (0, 0)),
                   pl.BlockSpec((B, Lp), lambda i: (0, 0)),
                   pl.BlockSpec((B, Lp), lambda i: (0, 0))),
    )(h_comb.astype(MXU_DTYPE), Wc.astype(MXU_DTYPE), bc, eps_p)
    return mu_f[:, :L], lv_f[:, :L], z_f[:, :L]


# ----------------------------------------------------------------------------
# Plain-JAX glue: NHWC im2col + layer wrappers
# ----------------------------------------------------------------------------
def im2col_nhwc(x, k, stride, pad):
    """x: (N, H, W, C) -> cols: (N*Ho*Wo, k*k*C), channel-minor (lane-friendly)."""
    N, H, W, C = x.shape
    if pad > 0:
        x = jnp.pad(x, ((0, 0), (pad, pad), (pad, pad), (0, 0)))
    Ho = (H + 2 * pad - k) // stride + 1
    Wo = (W + 2 * pad - k) // stride + 1
    patches = []
    for i in range(k):
        for j in range(k):
            patches.append(x[:, i:i + stride * (Ho - 1) + 1:stride,
                             j:j + stride * (Wo - 1) + 1:stride, :])
    cols = jnp.stack(patches, axis=3)                  # (N, Ho, Wo, k*k, C)
    return cols.reshape(N * Ho * Wo, k * k * C), Ho, Wo


def conv2d_block(x, w, b, gamma, beta, *, stride, pad, use_bn, act, out_dtype):
    """NHWC conv.  w: (Cout, Cin, k, k) PyTorch Conv2d layout."""
    N = x.shape[0]
    cout, cin, k, _ = w.shape
    cols, Ho, Wo = im2col_nhwc(x, k, stride, pad)
    w2 = jnp.transpose(w, (2, 3, 1, 0)).reshape(k * k * cin, cout)
    out = fused_gemm(cols, w2, b, gamma, beta, use_bn=use_bn, act=act,
                     groups=1, out_dtype=out_dtype)
    return out.reshape(N, Ho, Wo, cout)


# ConvTranspose2d(k=4, s=2, p=1) via sub-pixel decomposition: output phase
# (rh, rw) in {0,1}^2 at position (2m+rh, 2n+rw) is a stride-1 conv of the
# zero-padded input with a 2x2 subset of the 4x4 kernel.  All four phases share
# one 3x3 im2col (window offsets d=0,1,2 == input rows m-1, m, m+1) and run as
# a single GEMM whose output columns are (phase, channel).
#   phase r=0: window offset d=0 -> kernel tap 3, d=1 -> tap 1
#   phase r=1: window offset d=1 -> kernel tap 2, d=2 -> tap 0
_SUBPIX_TAPS = ({0: 3, 1: 1}, {1: 2, 2: 0})


def conv_transpose2d_block(x, w_t, b, gamma, beta, *, use_bn, act, out_dtype):
    """NHWC ConvTranspose2d(kernel=4, stride=2, padding=1). w_t: (Cin,Cout,4,4)."""
    N, H, W, Cin = x.shape
    Cout = w_t.shape[1]
    Cp = _round_up(Cout, 128)            # per-phase channel group, lane-aligned

    wc = jnp.zeros((3, 3, Cin, 2, 2, Cp), jnp.float32)
    for rh in (0, 1):
        for rw in (0, 1):
            for dh, kh in _SUBPIX_TAPS[rh].items():
                for dw, kw in _SUBPIX_TAPS[rw].items():
                    wc = wc.at[dh, dw, :, rh, rw, :Cout].set(w_t[:, :, kh, kw])
    wc = wc.reshape(9 * Cin, 4 * Cp)

    cols, _, _ = im2col_nhwc(x, 3, 1, 1)               # (N*H*W, 9*Cin)

    def pad_c(v):
        return jnp.pad(jnp.asarray(v, jnp.float32), (0, Cp - Cout))

    b4 = jnp.tile(pad_c(b), 4)
    g4 = jnp.tile(pad_c(gamma), 4) if use_bn else None
    be4 = jnp.tile(pad_c(beta), 4) if use_bn else None

    out = fused_gemm(cols, wc, b4, g4, be4, use_bn=use_bn, act=act,
                     groups=4, out_dtype=out_dtype)     # (N*H*W, 4*Cp)
    out = out.reshape(N, H, W, 2, 2, Cp)[..., :Cout]
    return out.transpose(0, 1, 3, 2, 4, 5).reshape(N, 2 * H, 2 * W, Cout)


# ----------------------------------------------------------------------------
# Parameters (deterministic synthetic init, PyTorch layouts)
# ----------------------------------------------------------------------------
def init_params(key, input_channels, num_classes, latent_dim, img_size):
    s = img_size // 16
    flat = 512 * s * s
    enc_ch = [input_channels, 64, 128, 256, 512]
    dec_ch = [512, 256, 128, 64, input_channels]
    keys = iter(jax.random.split(key, 64))

    def nrm(shape, scale):
        return scale * jax.random.normal(next(keys), shape, jnp.float32)

    p = {}
    for i in range(4):
        cin, cout = enc_ch[i], enc_ch[i + 1]
        p[f"enc{i}_w"] = nrm((cout, cin, 4, 4), 0.05)
        p[f"enc{i}_b"] = nrm((cout,), 0.05)
        p[f"enc{i}_g"] = 1.0 + nrm((cout,), 0.1)
        p[f"enc{i}_beta"] = nrm((cout,), 0.1)
    comb = flat + num_classes
    p["mu_w"] = nrm((latent_dim, comb), 0.05)          # torch Linear: (out, in)
    p["mu_b"] = nrm((latent_dim,), 0.05)
    p["lv_w"] = nrm((latent_dim, comb), 0.05)
    p["lv_b"] = nrm((latent_dim,), 0.05)
    p["dfc_w"] = nrm((flat, latent_dim + num_classes), 0.05)
    p["dfc_b"] = nrm((flat,), 0.05)
    p["dfc_g"] = 1.0 + nrm((flat,), 0.1)
    p["dfc_beta"] = nrm((flat,), 0.1)
    for i in range(4):
        cin, cout = dec_ch[i], dec_ch[i + 1]
        p[f"dec{i}_w"] = nrm((cin, cout, 4, 4), 0.05)  # ConvTranspose2d layout
        p[f"dec{i}_b"] = nrm((cout,), 0.05)
        if i < 3:
            p[f"dec{i}_g"] = 1.0 + nrm((cout,), 0.1)
            p[f"dec{i}_beta"] = nrm((cout,), 0.1)
    return p


# ----------------------------------------------------------------------------
# Full forward pass
# ----------------------------------------------------------------------------
def cvae_forward(params, x, y, eps, *, num_classes, latent_dim, img_size):
    B = x.shape[0]
    s = img_size // 16
    y_one_hot = jax.nn.one_hot(y, num_classes, dtype=jnp.float32)

    # NCHW -> NHWC once; all GEMMs run with channels on the 128-lane axis.
    h = jnp.transpose(x, (0, 2, 3, 1))
    for i in range(4):
        h = conv2d_block(h, params[f"enc{i}_w"], params[f"enc{i}_b"],
                         params[f"enc{i}_g"], params[f"enc{i}_beta"],
                         stride=2, pad=1, use_bn=True, act="leaky",
                         out_dtype=MXU_DTYPE)

    # nn.Flatten flattens NCHW -> keep the torch feature ordering for fc layers.
    h_flat = jnp.transpose(h, (0, 3, 1, 2)).reshape(B, -1)
    h_comb = jnp.concatenate([h_flat, y_one_hot.astype(h_flat.dtype)], axis=1)

    # TODO(synk): torch.randn_like uses torch's RNG stream; eps comes from
    # jax.random instead (same distribution, different bits).
    mu, logvar, z = latent_fused(h_comb, params["mu_w"], params["mu_b"],
                                 params["lv_w"], params["lv_b"], eps)

    zy = jnp.concatenate([z, y_one_hot], axis=1)
    hdec = fused_gemm(zy, params["dfc_w"].T, params["dfc_b"],
                      params["dfc_g"], params["dfc_beta"],
                      use_bn=True, act="leaky", out_dtype=MXU_DTYPE)
    # torch .view(-1, 512, s, s) is NCHW; convert to NHWC for the deconv stack.
    h = hdec.reshape(B, 512, s, s).transpose(0, 2, 3, 1)

    for i in range(3):
        h = conv_transpose2d_block(h, params[f"dec{i}_w"], params[f"dec{i}_b"],
                                   params[f"dec{i}_g"], params[f"dec{i}_beta"],
                                   use_bn=True, act="leaky", out_dtype=MXU_DTYPE)
    x_rec = conv_transpose2d_block(h, params["dec3_w"], params["dec3_b"],
                                   None, None, use_bn=False, act="tanh",
                                   out_dtype=jnp.float32)
    return jnp.transpose(x_rec, (0, 3, 1, 2)), mu, logvar


# ----------------------------------------------------------------------------
if __name__ == "__main__":
    B = 2
    INPUT_CHANNELS = 4
    NUM_CLASSES = 10
    LATENT_DIM = 16
    IMG_SIZE = 16          # img_size // 16 == 1, consistent with the module

    root = jax.random.PRNGKey(0)
    k_params, k_x, k_y, k_eps = jax.random.split(root, 4)

    params = init_params(k_params, INPUT_CHANNELS, NUM_CLASSES, LATENT_DIM, IMG_SIZE)
    x = jax.random.normal(k_x, (B, INPUT_CHANNELS, IMG_SIZE, IMG_SIZE), jnp.float32)
    y = jax.random.randint(k_y, (B,), 0, NUM_CLASSES)
    eps = jax.random.normal(k_eps, (B, LATENT_DIM), jnp.float32)

    x_rec, mu, logvar = cvae_forward(params, x, y, eps,
                                     num_classes=NUM_CLASSES,
                                     latent_dim=LATENT_DIM,
                                     img_size=IMG_SIZE)
    jax.block_until_ready((x_rec, mu, logvar))

    assert x_rec.shape == (B, INPUT_CHANNELS, IMG_SIZE, IMG_SIZE)
    assert mu.shape == (B, LATENT_DIM) and logvar.shape == (B, LATENT_DIM)
    assert bool(jnp.all(jnp.isfinite(x_rec)))
    assert bool(jnp.all(jnp.isfinite(mu))) and bool(jnp.all(jnp.isfinite(logvar)))
    print("KERNEL_OK")
</pallas_src>

<mosaic_0001>
module attributes {stable_mosaic.version = 11 : i64} {
  func.func @_gemm_bn_act_kernel(%arg0: i32, %arg1: i32, %arg2: memref<128x128xbf16, #tpu.memory_space<vmem>>, %arg3: memref<128x128xbf16, #tpu.memory_space<vmem>>, %arg4: memref<1x128xf32, #tpu.memory_space<vmem>>, %arg5: memref<1x128xf32, #tpu.memory_space<vmem>>, %arg6: memref<1x128xf32, #tpu.memory_space<vmem>>, %arg7: memref<128x128xbf16, #tpu.memory_space<vmem>>, %arg8: memref<128x128xf32, #tpu.memory_space<vmem>>) attributes {dimension_semantics = [#tpu.dimension_semantics<parallel>, #tpu.dimension_semantics<arbitrary>], iteration_bounds = array<i64: 1, 1>, scalar_prefetch = 0 : i64, scratch_operands = 1 : i64, tpu.core_type = #tpu.core_type<tc>, window_params = [{transform_indices = @transform_0, window_bounds = array<i64: 128, 128>}, {transform_indices = @transform_1, window_bounds = array<i64: 128, 128>}, {transform_indices = @transform_2, window_bounds = array<i64: 1, 128>}, {transform_indices = @transform_3, window_bounds = array<i64: 1, 128>}, {transform_indices = @transform_4, window_bounds = array<i64: 1, 128>}, {transform_indices = @transform_5, window_bounds = array<i64: 128, 128>}]} {
    %c0_i32 = arith.constant 0 : i32
    %0 = arith.cmpi eq, %arg1, %c0_i32 : i32
    %1 = arith.extui %0 : i1 to i32
    %c0_i32_0 = arith.constant 0 : i32
    %2 = arith.cmpi ne, %1, %c0_i32_0 : i32
    scf.if %2 {
      %cst_10 = arith.constant 0.000000e+00 : f32
      %12 = vector.broadcast %cst_10 : f32 to vector<128x128xf32>
      %c0_11 = arith.constant 0 : index
      %c0_12 = arith.constant 0 : index
      %13 = vector.load %arg8[%c0_11, %c0_12] : memref<128x128xf32, #tpu.memory_space<vmem>>, vector<128x128xf32>
      tpu.vector_store %arg8[%c0_11, %c0_12], %12 {strides = array<i32>} : memref<128x128xf32, #tpu.memory_space<vmem>>, vector<128x128xf32>,
    } else {
    }
    %c0 = arith.constant 0 : index
    %c0_1 = arith.constant 0 : index
    %3 = vector.load %arg8[%c0, %c0_1] : memref<128x128xf32, #tpu.memory_space<vmem>>, vector<128x128xf32>
    %c0_2 = arith.constant 0 : index
    %c0_3 = arith.constant 0 : index
    %4 = vector.load %arg2[%c0_2, %c0_3] : memref<128x128xbf16, #tpu.memory_space<vmem>>, vector<128x128xbf16>
    %c0_4 = arith.constant 0 : index
    %c0_5 = arith.constant 0 : index
    %5 = vector.load %arg3[%c0_4, %c0_5] : memref<128x128xbf16, #tpu.memory_space<vmem>>, vector<128x128xbf16>
    %cst = arith.constant dense<0.000000e+00> : vector<128x128xf32>
    %6 = tpu.matmul %4, %5, %cst {dimension_numbers = #tpu.dot_dimension_numbers<[1], [0], [0], [1], [0, 0, 1, 1], [], []>} : vector<128x128xbf16>, vector<128x128xbf16>, vector<128x128xf32> -> vector<128x128xf32>
    %7 = arith.addf %3, %6 : vector<128x128xf32>
    %c0_6 = arith.constant 0 : index
    %c0_7 = arith.constant 0 : index
    %8 = vector.load %arg8[%c0_6, %c0_7] : memref<128x128xf32, #tpu.memory_space<vmem>>, vector<128x128xf32>
    tpu.vector_store %arg8[%c0_6, %c0_7], %7 {strides = array<i32>} : memref<128x128xf32, #tpu.memory_space<vmem>>, vector<128x128xf32>,
    %c0_i32_8 = arith.constant 0 : i32
    %9 = arith.cmpi eq, %arg1, %c0_i32_8 : i32
    %10 = arith.extui %9 : i1 to i32
    %c0_i32_9 = arith.constant 0 : i32
    %11 = arith.cmpi ne, %10, %c0_i32_9 : i32
    scf.if %11 {
      %c0_10 = arith.constant 0 : index
      %c0_11 = arith.constant 0 : index
      %12 = vector.load %arg8[%c0_10, %c0_11] : memref<128x128xf32, #tpu.memory_space<vmem>>, vector<128x128xf32>
      %c0_12 = arith.constant 0 : index
      %c0_13 = arith.constant 0 : index
      %13 = vector.load %arg4[%c0_12, %c0_13] : memref<1x128xf32, #tpu.memory_space<vmem>>, vector<1x128xf32>
      %14 = vector.broadcast %13 : vector<1x128xf32> to vector<128x128xf32>
      %15 = arith.addf %12, %14 : vector<128x128xf32>
      %cst_14 = arith.constant dense<0.000000e+00> : vector<128xf32>
      %16 = vector.multi_reduction <add>, %15, %cst_14 [0] : vector<128x128xf32> to vector<128xf32>
      %17 = vector.shape_cast %16 : vector<128xf32> to vector<1x128xf32>
      %cst_15 = arith.constant 1.280000e+02 : f32
      %18 = vector.broadcast %cst_15 : f32 to vector<1x128xf32>
      %19 = arith.divf %17, %18 : vector<1x128xf32>
      %20 = vector.broadcast %19 : vector<1x128xf32> to vector<128x128xf32>
      %21 = arith.subf %15, %20 : vector<128x128xf32>
      %22 = arith.mulf %21, %21 : vector<128x128xf32>
      %cst_16 = arith.constant dense<0.000000e+00> : vector<128xf32>
      %23 = vector.multi_reduction <add>, %22, %cst_16 [0] : vector<128x128xf32> to vector<128xf32>
      %24 = vector.shape_cast %23 : vector<128xf32> to vector<1x128xf32>
      %cst_17 = arith.constant 1.280000e+02 : f32
      %25 = vector.broadcast %cst_17 : f32 to vector<1x128xf32>
      %26 = arith.divf %24, %25 : vector<1x128xf32>
      %c0_18 = arith.constant 0 : index
      %c0_19 = arith.constant 0 : index
      %27 = vector.load %arg5[%c0_18, %c0_19] : memref<1x128xf32, #tpu.memory_space<vmem>>, vector<1x128xf32>
      %28 = vector.broadcast %19 : vector<1x128xf32> to vector<128x128xf32>
      %29 = arith.subf %15, %28 : vector<128x128xf32>
      %30 = vector.broadcast %27 : vector<1x128xf32> to vector<128x128xf32>
      %31 = arith.mulf %30, %29 : vector<128x128xf32>
      %cst_20 = arith.constant 9.99999974E-6 : f32
      %32 = vector.broadcast %cst_20 : f32 to vector<1x128xf32>
      %33 = arith.addf %26, %32 : vector<1x128xf32>
      %34 = math.rsqrt %33 : vector<1x128xf32>
      %35 = vector.broadcast %34 : vector<1x128xf32> to vector<128x128xf32>
      %36 = arith.mulf %31, %35 : vector<128x128xf32>
      %c0_21 = arith.constant 0 : index
      %c0_22 = arith.constant 0 : index
      %37 = vector.load %arg6[%c0_21, %c0_22] : memref<1x128xf32, #tpu.memory_space<vmem>>, vector<1x128xf32>
      %38 = vector.broadcast %37 : vector<1x128xf32> to vector<128x128xf32>
      %39 = arith.addf %36, %38 : vector<128x128xf32>
      %cst_23 = arith.constant 0.000000e+00 : f32
      %40 = vector.broadcast %cst_23 : f32 to vector<128x128xf32>
      %41 = arith.cmpf oge, %39, %40 : vector<128x128xf32>
      %cst_24 = arith.constant 2.000000e-01 : f32
      %42 = vector.broadcast %cst_24 : f32 to vector<128x128xf32>
      %43 = arith.mulf %42, %39 : vector<128x128xf32>
      %44 = arith.select %41, %39, %43 : vector<128x128xi1>, vector<128x128xf32>
      %45 = arith.truncf %44 : vector<128x128xf32> to vector<128x128xbf16>
      %c0_25 = arith.constant 0 : index
      %c0_26 = arith.constant 0 : index
      %46 = vector.load %arg7[%c0_25, %c0_26] : memref<128x128xbf16, #tpu.memory_space<vmem>>, vector<128x128xbf16>
      tpu.vector_store %arg7[%c0_25, %c0_26], %45 {strides = array<i32>} : memref<128x128xbf16, #tpu.memory_space<vmem>>, vector<128x128xbf16>,
    } else {
    }
    return
  }
  func.func @transform_0(%arg0: i32, %arg1: i32) -> (i32, i32) {
    %c0_i32 = arith.constant 0 : i32
    %c0_i32_0 = arith.constant 0 : i32
    return %c0_i32, %arg1 : i32, i32
  }
  func.func @transform_1(%arg0: i32, %arg1: i32) -> (i32, i32) {
    %c0_i32 = arith.constant 0 : i32
    return %arg1, %arg0 : i32, i32
  }
  func.func @transform_2(%arg0: i32, %arg1: i32) -> (i32, i32) {
    %c0_i32 = arith.constant 0 : i32
    %c0_i32_0 = arith.constant 0 : i32
    return %c0_i32, %arg0 : i32, i32
  }
  func.func @transform_3(%arg0: i32, %arg1: i32) -> (i32, i32) {
    %c0_i32 = arith.constant 0 : i32
    %c0_i32_0 = arith.constant 0 : i32
    return %c0_i32, %arg0 : i32, i32
  }
  func.func @transform_4(%arg0: i32, %arg1: i32) -> (i32, i32) {
    %c0_i32 = arith.constant 0 : i32
    %c0_i32_0 = arith.constant 0 : i32
    return %c0_i32, %arg0 : i32, i32
  }
  func.func @transform_5(%arg0: i32, %arg1: i32) -> (i32, i32) {
    %c0_i32 = arith.constant 0 : i32
    %c0_i32_0 = arith.constant 0 : i32
    return %c0_i32, %arg0 : i32, i32
  }
}

</mosaic_0001>

<bundles_post_ra>
// kernel: tpu_custom_call.1
= control target key start
LH: loop header
LB: loop body
LE: loop exit
PB: predicated region body
PF: predicated region fallthrough
CT: control target
= control target key end

     0   :  { %10 = vsyncpa [#allocation4], 0  ;;  %s1027_s0 = inlined_call_operand.hbm [shape: bf16[128,128], index: 0, kind: input, shape index: {}]   ;;  %s1028_s1 = inlined_call_operand.hbm [shape: bf16[128,128], index: 1, kind: input, shape index: {}]   ;;  %s1029_s2 = inlined_call_operand.vmem [shape: f32[1,128], index: 2, kind: input, shape index: {}]   ;;  %s1030_s3 = inlined_call_operand.vmem [shape: f32[1,128], index: 3, kind: input, shape index: {}]   ;;  %s1031_s4 = inlined_call_operand.vmem [shape: f32[1,128], index: 4, kind: input, shape index: {}]   ;;  %s1032_s5 = inlined_call_operand.hbm [shape: bf16[128,128], index: 5, kind: output, shape index: {}]  }
   0x1   :  { %11 = vsyncpa [#allocation7], 0 }
   0x2   :  { %12 = vsyncpa [#allocation5], 0  ;;  %s923_s18 = smov [#allocation3]  }
   0x3   :  { %s18_s19 = sshll.u32 %s923_s18, 4  ;;  %s19_s19 = int_to_ptr.vmem [resolvable:$true] %s18_s19 }
   0x4   :  { %s865_s20 = scalar_lea.vmem %s19_s19, 1024  ;;  %p870_p1 = scmp.lt.s32.totalorder %s19_s19, %s19_s19 }
   0x5   :  { %p866_p0 = scmp.ne.s32.totalorder %s19_s19, %s865_s20  ;;  %p871_p2 = scmp.lt.s32.totalorder %s865_s20, %s865_s20 }
   0x7   :  { %p872_p3 = por %p871_p2, %p870_p1 }
   0x9   :  { %p873_p4 = pnand %p872_p3, %p866_p0 }
   0xb   :  { %876 = shalt.err (!%p873_p4)
}
   0xc   :  { %s924_s21 = smov 64   ;;  %s925_s22 = smov 4  }
   0xd   :  { %24 = dma.hbm_to_vmem [thread:$0]  %s1027_s0, 1024, %s19_s19, [#allocation4], %s924_s21, %s924_s21, %s925_s22  }
   0xe   :  { %s926_s25 = smov [#allocation6]  }
   0xf   :  { %s30_s26 = sshll.u32 %s926_s25, 4  ;;  %s31_s26 = int_to_ptr.vmem [resolvable:$true] %s30_s26 }
  0x10   :  { %s885_s27 = scalar_lea.vmem %s31_s26, 1024  ;;  %p890_p6 = scmp.lt.s32.totalorder %s31_s26, %s31_s26 }
  0x11   :  { %p886_p5 = scmp.ne.s32.totalorder %s31_s26, %s885_s27  ;;  %p891_p7 = scmp.lt.s32.totalorder %s885_s27, %s885_s27 }
  0x13   :  { %p892_p8 = por %p891_p7, %p890_p6 }
  0x15   :  { %p893_p9 = pnand %p892_p8, %p886_p5 }
  0x17   :  { %896 = shalt.err (!%p893_p9)
}
  0x18   :  { %36 = dma.hbm_to_vmem [thread:$0]  %s1028_s1, 1024, %s31_s26, [#allocation7], %s924_s21, %s924_s21, %s925_s22  }
  0x19   :  { %917 = dma.done.wait [#allocation4], 1024  }
  0x1a   :  { %918 = vsyncadd [#allocation4], 4294966272 }
  0x1b   :  { %919 = dma.done.wait [#allocation7], 1024  }
  0x1c   :  { %920 = vsyncadd [#allocation7], 4294966272  ;;  %v839_v0 = vld [vmem:[#allocation6 + $0x38] sm:$0xff]   ;;  %v840_v1 = vld [vmem:[#allocation6 + $0x30] sm:$0xff]  }
  0x1d   :  { %786 = vmatprep.subr.bf16.mxu0 %v839_v0  ;;  %818 = vmatprep.subr.bf16.mxu1 %v839_v0  ;;  %v841_v2 = vld [vmem:[#allocation6 + $0x28] sm:$0xff]   ;;  %v842_v3 = vld [vmem:[#allocation6 + $0x20] sm:$0xff]   ;;  %v843_v5 = vld [vmem:[#allocation6 + $0x18] sm:$0xff]  }
  0x1e   :  { %787 = vmatpush3.bf16.msra.mxu0 %v839_v0  ;;  %826 = vmatpush3.bf16.msra.mxu1 %v839_v0  ;;  %v847_v4 = vld [vmem:[#allocation3] sm:$0xff]   ;;  %v844_v7 = vld [vmem:[#allocation6 + $0x10] sm:$0xff]   ;;  %v845_v8 = vld [vmem:[#allocation6 + $0x8] sm:$0xff]  }
  0x1f   :  { %788 = vmatprep.subr.bf16.mxu0 %v840_v1  ;;  %819 = vmatprep.subr.bf16.mxu1 %v840_v1  ;;  %v851_v6 = vld [vmem:[#allocation3 + $0x20] sm:$0xff]   ;;  %v848_v10 = vld [vmem:[#allocation3 + $0x8] sm:$0xff]   ;;  %v849_v12 = vld [vmem:[#allocation3 + $0x10] sm:$0xff]  }
  0x20   :  { %802 = vmatprep.mubr.bf16.mxu0 %v847_v4  ;;  %810 = vmatprep.mubr.bf16.mxu1 %v851_v6  ;;  %v846_v9 = vld [vmem:[#allocation6] sm:$0xff]   ;;  %v852_v11 = vld [vmem:[#allocation3 + $0x28] sm:$0xff]   ;;  %v853_v13 = vld [vmem:[#allocation3 + $0x30] sm:$0xff]  }
  0x21   :  { %v850_v14 = vld [vmem:[#allocation3 + $0x18] sm:$0xff]   ;;  %v688_v21 = vld [vmem:[%s1029_s2] ss:$0 sm:$0xff] }
  0x22   :  { %789 = vmatpush3.bf16.msra.mxu0 %v840_v1  ;;  %827 = vmatpush3.bf16.msra.mxu1 %v840_v1  ;;  %v854_v15 = vld [vmem:[#allocation3 + $0x38] sm:$0xff]  }
  0x23   :  { %790 = vmatprep.subr.bf16.mxu0 %v841_v2  ;;  %820 = vmatprep.subr.bf16.mxu1 %v841_v2 }
  0x26   :  { %791 = vmatpush3.bf16.msra.mxu0 %v841_v2  ;;  %828 = vmatpush3.bf16.msra.mxu1 %v841_v2 }
  0x27   :  { %792 = vmatprep.subr.bf16.mxu0 %v842_v3  ;;  %821 = vmatprep.subr.bf16.mxu1 %v842_v3 }
  0x2a   :  { %793 = vmatpush3.bf16.msra.mxu0 %v842_v3  ;;  %829 = vmatpush3.bf16.msra.mxu1 %v842_v3 }
  0x2b   :  { %794 = vmatprep.subr.bf16.mxu0 %v843_v5  ;;  %822 = vmatprep.subr.bf16.mxu1 %v843_v5 }
  0x2e   :  { %795 = vmatpush3.bf16.msra.mxu0 %v843_v5  ;;  %830 = vmatpush3.bf16.msra.mxu1 %v843_v5 }
  0x2f   :  { %796 = vmatprep.subr.bf16.mxu0 %v844_v7  ;;  %823 = vmatprep.subr.bf16.mxu1 %v844_v7 }
  0x32   :  { %797 = vmatpush3.bf16.msra.mxu0 %v844_v7  ;;  %831 = vmatpush3.bf16.msra.mxu1 %v844_v7 }
  0x33   :  { %798 = vmatprep.subr.bf16.mxu0 %v845_v8  ;;  %824 = vmatprep.subr.bf16.mxu1 %v845_v8 }
  0x36   :  { %799 = vmatpush3.bf16.msra.mxu0 %v845_v8  ;;  %832 = vmatpush3.bf16.msra.mxu1 %v845_v8 }
  0x37   :  { %800 = vmatprep.subr.bf16.mxu0 %v846_v9  ;;  %825 = vmatprep.subr.bf16.mxu1 %v846_v9 }
  0x3a   :  { %801 = vmatpush3.bf16.msra.mxu0 %v846_v9  ;;  %833 = vmatpush3.bf16.msra.mxu1 %v846_v9 }
  0x3d   :  { %803 = vmatmul.mubr.bf16.vlgmr.msra.gmra.mxu0 %v848_v10  ;;  %811 = vmatmul.mubr.bf16.vlgmr.msra.gmra.mxu1 %v852_v11 }
  0x3e   :  { %806 = vmatprep.mubr.bf16.mxu0 %v849_v12  ;;  %814 = vmatprep.mubr.bf16.mxu1 %v853_v13 }
  0x45   :  { %807 = vmatmul.mubr.bf16.gmra.mxu0 %v850_v14  ;;  %815 = vmatmul.mubr.bf16.gmra.mxu1 %v854_v15 }
  0xfd   :  { %v804_v16 = vpop.f32.mrf.mxu0  ;;  %v812_v17 = vpop.f32.mrf.mxu1 }
  0xfe   :  { %v371_v27 = vadd.f32 %v804_v16, %v688_v21  ;;  %v379_v50 = vadd.f32 %v812_v17, %v688_v21 }
  0xff   :  { %v248_v18 = vpop.f32.mrf.mxu0  ;;  %v280_v20 = vpop.f32.mrf.mxu1 }
 0x100   :  { %v369_v23 = vadd.f32 %v688_v21, %v248_v18  ;;  %v377_v45 = vadd.f32 %v688_v21, %v280_v20 }
 0x101   :  { %v805_v19 = vpop.f32.mrf.mxu0  ;;  %v813_v26 = vpop.f32.mrf.mxu1 }
 0x102   :  { %v372_v30 = vadd.f32 %v805_v19, %v688_v21  ;;  %v380_v52 = vadd.f32 %v813_v26, %v688_v21 }
 0x103   :  { %v251_v22 = vpop.f32.mrf.mxu0  ;;  %v283_v33 = vpop.f32.mrf.mxu1 }
 0x104   :  { %v370_v24 = vadd.f32 %v688_v21, %v251_v22  ;;  %v378_v47 = vadd.f32 %v688_v21, %v283_v33 }
 0x105   :  { %v808_v25 = vpop.f32.mrf.mxu0  ;;  %v816_v39 = vpop.f32.mrf.mxu1 }
 0x106   :  { %v385_v28 = vadd.f32 %v370_v24, %v369_v23  ;;  %v375_v40 = vadd.f32 %v808_v25, %v688_v21  ;;  %v383_v59 = vadd.f32 %v816_v39, %v688_v21 }
 0x107   :  { %v264_v29 = vpop.f32.mrf.mxu0  ;;  %v296_v44 = vpop.f32.mrf.mxu1 }
 0x108   :  { %v386_v31 = vadd.f32 %v385_v28, %v371_v27  ;;  %v373_v34 = vadd.f32 %v688_v21, %v264_v29  ;;  %v381_v55 = vadd.f32 %v688_v21, %v296_v44 }
 0x109   :  { %v809_v32 = vpop.f32.mrf.mxu0  ;;  %v817_v49 = vpop.f32.mrf.mxu1 }
 0x10a   :  { %v387_v35 = vadd.f32 %v386_v31, %v372_v30  ;;  %v376_v42 = vadd.f32 %v809_v32, %v688_v21  ;;  %v384_v61 = vadd.f32 %v817_v49, %v688_v21 }
 0x10b   :  { %v267_v36 = vpop.f32.mrf.mxu0  ;;  %v299_v54 = vpop.f32.mrf.mxu1 }
 0x10c   :  { %v388_v37 = vadd.f32 %v387_v35, %v373_v34  ;;  %v374_v38 = vadd.f32 %v688_v21, %v267_v36  ;;  %v382_v58 = vadd.f32 %v688_v21, %v299_v54 }
 0x10e   :  { %v389_v41 = vadd.f32 %v388_v37, %v374_v38 }
 0x110   :  { %v390_v43 = vadd.f32 %v389_v41, %v375_v40 }
 0x112   :  { %v391_v46 = vadd.f32 %v390_v43, %v376_v42 }
 0x114   :  { %v392_v48 = vadd.f32 %v391_v46, %v377_v45 }
 0x116   :  { %v393_v51 = vadd.f32 %v392_v48, %v378_v47 }
 0x118   :  { %v394_v53 = vadd.f32 %v393_v51, %v379_v50 }
 0x11a   :  { %v395_v56 = vadd.f32 %v394_v53, %v380_v52 }
 0x11c   :  { %v396_v57 = vadd.f32 %v395_v56, %v381_v55 }
 0x11e   :  { %v397_v60 = vadd.f32 %v396_v57, %v382_v58 }
 0x120   :  { %v398_v62 = vadd.f32 %v397_v60, %v383_v59 }
 0x122   :  { %v399_v63 = vadd.f32 %v398_v62, %v384_v61 }
 0x124   :  { %v400_v0 = vrot.slane %v399_v63, 4 }
 0x126   :  { %v401_v1 = vadd.f32 %v400_v0, %v399_v63 }
 0x128   :  { %v402_v2 = vrot.slane %v401_v1, 2 }
 0x12a   :  { %v403_v3 = vadd.f32 %v402_v2, %v401_v1 }
 0x12c   :  { %v404_v4 = vrot.slane %v403_v3, 1 }
 0x12e   :  { %v405_v5 = vadd.f32 %v404_v4, %v403_v3 }
 0x130   :  { %v407_v6 = vmul.f32 0.0078125, %v405_v5 }
 0x132   :  { %v973_v7 = vsub.f32 %v369_v23, %v407_v6  ;;  %v975_v8 = vsub.f32 %v370_v24, %v407_v6  ;;  %v410_v9 = vsub.f32 %v371_v27, %v407_v6  ;;  %v411_v12 = vsub.f32 %v372_v30, %v407_v6 }
 0x133   :  { %v412_v13 = vsub.f32 %v373_v34, %v407_v6  ;;  %v413_v16 = vsub.f32 %v374_v38, %v407_v6  ;;  %v414_v19 = vsub.f32 %v375_v40, %v407_v6  ;;  %v415_v22 = vsub.f32 %v376_v42, %v407_v6 }
 0x134   :  { %v424_v10 = vmul.f32 %v973_v7, %v973_v7  ;;  %v425_v11 = vmul.f32 %v975_v8, %v975_v8  ;;  %v426_v14 = vmul.f32 %v410_v9, %v410_v9  ;;  %v427_v17 = vmul.f32 %v411_v12, %v411_v12 }
 0x135   :  { %v428_v20 = vmul.f32 %v412_v13, %v412_v13  ;;  %v429_v23 = vmul.f32 %v413_v16, %v413_v16  ;;  %v416_v25 = vsub.f32 %v377_v45, %v407_v6  ;;  %v430_v26 = vmul.f32 %v414_v19, %v414_v19 }
 0x136   :  { %v440_v15 = vadd.f32 %v425_v11, %v424_v10  ;;  %v417_v28 = vsub.f32 %v378_v47, %v407_v6  ;;  %v431_v29 = vmul.f32 %v415_v22, %v415_v22  ;;  %v418_v32 = vsub.f32 %v379_v50, %v407_v6 }
 0x137   :  { %v432_v30 = vmul.f32 %v416_v25, %v416_v25  ;;  %v419_v34 = vsub.f32 %v380_v52, %v407_v6  ;;  %v420_v37 = vsub.f32 %v381_v55, %v407_v6  ;;  %v421_v40 = vsub.f32 %v382_v58, %v407_v6 }
 0x138   :  { %v441_v18 = vadd.f32 %v440_v15, %v426_v14  ;;  %v433_v35 = vmul.f32 %v417_v28, %v417_v28  ;;  %v434_v38 = vmul.f32 %v418_v32, %v418_v32  ;;  %v422_v43 = vsub.f32 %v383_v59, %v407_v6  ;;  %v689_v59 = vld [vmem:[%s1030_s3] ss:$0 sm:$0xff] }
 0x139   :  { %v435_v41 = vmul.f32 %v419_v34, %v419_v34  ;;  %v436_v44 = vmul.f32 %v420_v37, %v420_v37  ;;  %v423_v46 = vsub.f32 %v384_v61, %v407_v6  ;;  %v437_v48 = vmul.f32 %v421_v40, %v421_v40 }
 0x13a   :  { %v442_v21 = vadd.f32 %v441_v18, %v427_v17  ;;  %v438_v49 = vmul.f32 %v422_v43, %v422_v43  ;;  %v471_v61 = vmul.f32 %v689_v59, %v410_v9  ;;  %v984_v0 = vmul.f32 %v689_v59, %v411_v12  ;;  %v690_v12 = vld [vmem:[%s1031_s4] ss:$0 sm:$0xff]  ;;  %s927_s4 = smov [#allocation8]  }
 0x13b   :  { %v439_v50 = vmul.f32 %v423_v46, %v423_v46  ;;  %v473_v1 = vmul.f32 %v689_v59, %v412_v13  ;;  %v474_v2 = vmul.f32 %v689_v59, %v413_v16  ;;  %v475_v3 = vmul.f32 %v689_v59, %v414_v19  ;;  %s659_s7 = sshll.u32 %s927_s4, 4  ;;  %s660_s7 = int_to_ptr.vmem [resolvable:$true] %s659_s7 }
 0x13c   :  { %v443_v24 = vadd.f32 %v442_v21, %v428_v20  ;;  %v476_v4 = vmul.f32 %v689_v59, %v415_v22  ;;  %v477_v5 = vmul.f32 %v689_v59, %v416_v25  ;;  %v478_v6 = vmul.f32 %v689_v59, %v417_v28  ;;  %s897_s8 = scalar_lea.vmem %s660_s7, 1024  ;;  %p902_p11 = scmp.lt.s32.totalorder %s660_s7, %s660_s7 }
 0x13d   :  { %v479_v10 = vmul.f32 %v689_v59, %v418_v32  ;;  %v480_v11 = vmul.f32 %v689_v59, %v419_v34  ;;  %v481_v14 = vmul.f32 %v689_v59, %v420_v37  ;;  %v482_v17 = vmul.f32 %v689_v59, %v421_v40  ;;  %p898_p10 = scmp.ne.s32.totalorder %s660_s7, %s897_s8  ;;  %p903_p12 = scmp.lt.s32.totalorder %s897_s8, %s897_s8 }
 0x13e   :  { %v444_v27 = vadd.f32 %v443_v24, %v429_v23  ;;  %v483_v18 = vmul.f32 %v689_v59, %v422_v43  ;;  %v484_v20 = vmul.f32 %v689_v59, %v423_v46  ;;  %v469_v21 = vmul.f32 %v689_v59, %v973_v7 }
 0x13f   :  { %v470_v13 = vmul.f32 %v689_v59, %v975_v8  ;;  %p904_p13 = por %p903_p12, %p902_p11 }
 0x140   :  { %v445_v31 = vadd.f32 %v444_v27, %v430_v26 }
 0x141   :  { %p905_p0 = pnand %p904_p13, %p898_p10 }
 0x142   :  { %v446_v33 = vadd.f32 %v445_v31, %v431_v29 }
 0x144   :  { %v447_v36 = vadd.f32 %v446_v33, %v432_v30 }
 0x146   :  { %v448_v39 = vadd.f32 %v447_v36, %v433_v35 }
 0x148   :  { %v449_v42 = vadd.f32 %v448_v39, %v434_v38 }
 0x14a   :  { %v450_v45 = vadd.f32 %v449_v42, %v435_v41 }
 0x14c   :  { %v451_v47 = vadd.f32 %v450_v45, %v436_v44 }
 0x14e   :  { %v452_v51 = vadd.f32 %v451_v47, %v437_v48 }
 0x150   :  { %v453_v53 = vadd.f32 %v452_v51, %v438_v49 }
 0x152   :  { %v454_v54 = vadd.f32 %v453_v53, %v439_v50 }
 0x154   :  { %v455_v52 = vrot.slane %v454_v54, 4 }
 0x156   :  { %v456_v56 = vadd.f32 %v455_v52, %v454_v54 }
 0x158   :  { %v457_v57 = vrot.slane %v456_v56, 2 }
 0x15a   :  { %v458_v55 = vadd.f32 %v457_v57, %v456_v56 }
 0x15c   :  { %v459_v60 = vrot.slane %v458_v55, 1 }
 0x15e   :  { %v460_v62 = vadd.f32 %v459_v60, %v458_v55 }
 0x160   :  { %v461_v58 = vmul.f32 0.0078125, %v460_v62 }
 0x162   :  { %v485_v63 = vadd.f32 1e-05, %v461_v58 }
 0x164   :  { %855 = vrsqrt.f32 %v485_v63 }
 0x171   :  { %v856_v15 = vpop.eup %855 }
 0x172   :  { %v491_v23 = vmul.f32 %v856_v15, %v473_v1  ;;  %v493_v24 = vmul.f32 %v856_v15, %v475_v3  ;;  %v494_v9 = vmul.f32 %v856_v15, %v476_v4  ;;  %v495_v16 = vmul.f32 %v856_v15, %v477_v5 }
 0x173   :  { %v496_v19 = vmul.f32 %v856_v15, %v478_v6  ;;  %v497_v22 = vmul.f32 %v856_v15, %v479_v10  ;;  %v498_v25 = vmul.f32 %v856_v15, %v480_v11  ;;  %v499_v26 = vmul.f32 %v856_v15, %v481_v14 }
 0x174   :  { %v500_v27 = vmul.f32 %v856_v15, %v482_v17  ;;  %v501_v28 = vmul.f32 %v856_v15, %v483_v18  ;;  %v502_v29 = vmul.f32 %v856_v15, %v484_v20  ;;  %v492_v31 = vmul.f32 %v856_v15, %v474_v2 }
 0x175   :  { %v991_v32 = vadd.f32 %v690_v12, %v493_v24  ;;  %v518_v7 = vadd.f32 %v690_v12, %v495_v16  ;;  %v993_v30 = vadd.f32 %v690_v12, %v496_v19  ;;  %v520_v33 = vadd.f32 %v690_v12, %v497_v22 }
 0x176   :  { %v521_v34 = vadd.f32 %v690_v12, %v498_v25  ;;  %v522_v35 = vadd.f32 %v690_v12, %v499_v26  ;;  %v523_v36 = vadd.f32 %v690_v12, %v500_v27  ;;  %v995_v37 = vadd.f32 %v690_v12, %v494_v9 }
 0x177   :  { %v524_v8 = vadd.f32 %v690_v12, %v501_v28  ;;  %v525_v38 = vadd.f32 %v690_v12, %v502_v29  ;;  %v550_v39 = vmul.f32 0.2, %v518_v7  ;;  %vm535_vm0 = vcmp.ge.f32.partialorder %v993_v30, 0.0 }
 0x178   :  { %vm536_vm1 = vcmp.ge.f32.partialorder %v520_v33, 0.0  ;;  %vm537_vm2 = vcmp.ge.f32.partialorder %v521_v34, 0.0  ;;  %vm538_vm3 = vcmp.ge.f32.partialorder %v522_v35, 0.0  ;;  %vm539_vm4 = vcmp.ge.f32.partialorder %v523_v36, 0.0 }
 0x179   :  { %vm540_vm5 = vcmp.ge.f32.partialorder %v524_v8, 0.0  ;;  %vm541_vm6 = vcmp.ge.f32.partialorder %v525_v38, 0.0  ;;  %v551_v40 = vmul.f32 0.2, %v993_v30  ;;  %v552_v41 = vmul.f32 0.2, %v520_v33 }
 0x17a   :  { %v553_v42 = vmul.f32 0.2, %v521_v34  ;;  %v554_v43 = vmul.f32 0.2, %v522_v35  ;;  %v555_v44 = vmul.f32 0.2, %v523_v36  ;;  %v487_v45 = vmul.f32 %v856_v15, %v469_v21 }
 0x17b   :  { %v556_v46 = vmul.f32 0.2, %v524_v8  ;;  %v557_v48 = vmul.f32 0.2, %v525_v38  ;;  %v568_v47 = vsel %vm536_vm1, %v520_v33, %v552_v41  ;;  %v488_v49 = vmul.f32 %v856_v15, %v470_v13 }
 0x17c   :  { %v569_v51 = vsel %vm537_vm2, %v521_v34, %v553_v42  ;;  %v570_v50 = vsel %vm538_vm3, %v522_v35, %v554_v43  ;;  %v571_v53 = vsel %vm539_vm4, %v523_v36, %v555_v44  ;;  %v489_v54 = vmul.f32 %v856_v15, %v471_v61 }
 0x17d   :  { %v572_v52 = vsel %vm540_vm5, %v524_v8, %v556_v46  ;;  %v573_v56 = vsel %vm541_vm6, %v525_v38, %v557_v48  ;;  %v751_v57 = vpack.c.bf16 %v569_v51, %v568_v47  ;;  %v756_v55 = vpack.c.bf16 %v571_v53, %v570_v50 }
 0x17e   :  { %v761_v60 = vpack.c.bf16 %v573_v56, %v572_v52  ;;  %v490_v62 = vmul.f32 %v856_v15, %v984_v0  ;;  %v510_v58 = vadd.f32 %v690_v12, %v487_v45  ;;  %v511_v63 = vadd.f32 %v690_v12, %v488_v49 }
 0x17f   :  { %768 = vst [vmem:[#allocation8 + $0x30] sm:$0xff] %v756_v55   ;;  %767 = vst [vmem:[#allocation8 + $0x28] sm:$0xff] %v751_v57   ;;  %v512_v59 = vadd.f32 %v690_v12, %v489_v54  ;;  %v514_v1 = vadd.f32 %v690_v12, %v491_v23  ;;  %v515_v2 = vadd.f32 %v690_v12, %v492_v31  ;;  %vm532_vm7 = vcmp.ge.f32.partialorder %v991_v32, 0.0 }
 0x180   :  { %769 = vst [vmem:[#allocation8 + $0x38] sm:$0xff] %v761_v60   ;;  %v513_v61 = vadd.f32 %v690_v12, %v490_v62  ;;  %vm526_vm8 = vcmp.ge.f32.partialorder %v510_v58, 0.0  ;;  %vm527_vm9 = vcmp.ge.f32.partialorder %v511_v63, 0.0  ;;  %vm533_vm10 = vcmp.ge.f32.partialorder %v995_v37, 0.0 }
 0x181   :  { %vm528_vm11 = vcmp.ge.f32.partialorder %v512_v59, 0.0  ;;  %vm530_vm12 = vcmp.ge.f32.partialorder %v514_v1, 0.0  ;;  %vm531_vm13 = vcmp.ge.f32.partialorder %v515_v2, 0.0  ;;  %vm534_vm14 = vcmp.ge.f32.partialorder %v518_v7, 0.0 }
 0x182   :  { %vm529_vm15 = vcmp.ge.f32.partialorder %v513_v61, 0.0  ;;  %v542_v0 = vmul.f32 0.2, %v510_v58  ;;  %v543_v3 = vmul.f32 0.2, %v511_v63  ;;  %v566_v4 = vsel %vm534_vm14, %v518_v7, %v550_v39 }
 0x183   :  { %v544_v5 = vmul.f32 0.2, %v512_v59  ;;  %v545_v6 = vmul.f32 0.2, %v513_v61  ;;  %v546_v10 = vmul.f32 0.2, %v514_v1  ;;  %v567_v11 = vsel %vm535_vm0, %v993_v30, %v551_v40 }
 0x184   :  { %v547_v14 = vmul.f32 0.2, %v515_v2  ;;  %v548_v15 = vmul.f32 0.2, %v991_v32  ;;  %v549_v17 = vmul.f32 0.2, %v995_v37  ;;  %v558_v18 = vsel %vm526_vm8, %v510_v58, %v542_v0 }
 0x185   :  { %v559_v20 = vsel %vm527_vm9, %v511_v63, %v543_v3  ;;  %v560_v21 = vsel %vm528_vm11, %v512_v59, %v544_v5  ;;  %v561_v23 = vsel %vm529_vm15, %v513_v61, %v545_v6  ;;  %v562_v24 = vsel %vm530_vm12, %v514_v1, %v546_v10 }
 0x186   :  { %v563_v9 = vsel %vm531_vm13, %v515_v2, %v547_v14  ;;  %v564_v12 = vsel %vm532_vm7, %v991_v32, %v548_v15  ;;  %v565_v13 = vsel %vm533_vm10, %v995_v37, %v549_v17  ;;  %v726_v16 = vpack.c.bf16 %v559_v20, %v558_v18 }
 0x187   :  { %v731_v19 = vpack.c.bf16 %v561_v23, %v560_v21  ;;  %v736_v22 = vpack.c.bf16 %v563_v9, %v562_v24  ;;  %v741_v25 = vpack.c.bf16 %v565_v13, %v564_v12  ;;  %v746_v26 = vpack.c.bf16 %v567_v11, %v566_v4 }
 0x188   :  { %727 = vst [vmem:[#allocation8] sm:$0xff] %v726_v16  }
 0x189   :  { %763 = vst [vmem:[#allocation8 + $0x8] sm:$0xff] %v731_v19   ;;  %764 = vst [vmem:[#allocation8 + $0x10] sm:$0xff] %v736_v22  }
 0x18a   :  { %765 = vst [vmem:[#allocation8 + $0x18] sm:$0xff] %v741_v25   ;;  %766 = vst [vmem:[#allocation8 + $0x20] sm:$0xff] %v746_v26  }
 0x18b   :  { %908 = shalt.err (!%p905_p0)
}
 0x18c   :  { %665 = dma.vmem_to_hbm [thread:$0]  %s660_s7, 1024, %s1032_s5, [#allocation5], %s924_s21, %s924_s21, %s925_s22  }
 0x18d   :  { %921 = dma.done.wait [#allocation5], 1024  }
 0x18e   :  { %922 = vsyncadd [#allocation5], 4294966272 }
 0x18f   :  { %669 = vsyncpa [#allocation4], 1 }
 0x190   :  { %670 = vsyncpa [#allocation7], 1 }
 0x191   :  { %671 = vsyncpa [#allocation5], 1 }

</bundles_post_ra>
